<compile_context>
chip_gen: v7x
topology: tpu7x:2x2x1
jax: 0.10.0
libtpu: 0.0.40
codegen_flags: <defaults>
</compile_context>

<pallas_src>
import jax
import jax.numpy as jnp
from jax.experimental import pallas as pl
from jax.experimental.pallas import tpu as pltpu


def neg_mlp_kernel(x_ref, w1_ref, b1_ref, w2n_ref, b2n_ref, o_ref):
    # x tile in f32; cast to bf16 only for the MXU operands.
    x = x_ref[...].astype(jnp.bfloat16)

    # layer 1: Linear -> ReLU (bias add / ReLU in f32)
    h = jnp.dot(x, w1_ref[...], preferred_element_type=jnp.float32) + b1_ref[...]
    h = jnp.maximum(h, 0.0)

    # layer 2: Linear with negation + lane padding already folded into the
    # (pre-negated, zero-padded-to-128-lanes) weights/bias.
    y = jnp.dot(h.astype(jnp.bfloat16), w2n_ref[...],
                preferred_element_type=jnp.float32) + b2n_ref[...]

    # Lane-dense (tile_b, 128) store — no masked vst.msk epilogue.
    o_ref[...] = y.astype(o_ref.dtype)


def prepare_params(w1, b1, w2, b2, c_pad):
    """Fold RWrapper's negation into layer-2 params, pad output lanes to c_pad,
    and cast matmul weights to bf16 (biases stay f32)."""
    H, C = w2.shape
    w2n = jnp.pad(-w2, ((0, 0), (0, c_pad - C)))
    b2n = jnp.pad(-b2, ((0, 0), (0, c_pad - C)))
    return (w1.astype(jnp.bfloat16),
            b1.astype(jnp.float32),
            w2n.astype(jnp.bfloat16),
            b2n.astype(jnp.float32))


def rwrapper_forward(x, params, *, tile_b=8, c_pad=128):
    """y = -mlp(x), fused in a single Pallas kernel."""
    w1, b1, w2, b2 = params
    B, D = x.shape
    H, C = w2.shape
    assert B % tile_b == 0

    w1b, b1f, w2n, b2n = prepare_params(w1, b1, w2, b2, c_pad)

    out_full = pl.pallas_call(
        neg_mlp_kernel,
        out_shape=jax.ShapeDtypeStruct((B, c_pad), jnp.float32),
        grid=(B // tile_b,),
        in_specs=[
            pl.BlockSpec((tile_b, D), lambda i: (i, 0)),   # x: tiled over batch
            pl.BlockSpec((D, H),      lambda i: (0, 0)),   # W1: resident
            pl.BlockSpec((1, H),      lambda i: (0, 0)),   # b1: resident
            pl.BlockSpec((H, c_pad),  lambda i: (0, 0)),   # -W2 (padded): resident
            pl.BlockSpec((1, c_pad),  lambda i: (0, 0)),   # -b2 (padded): resident
        ],
        out_specs=pl.BlockSpec((tile_b, c_pad), lambda i: (i, 0)),
        compiler_params=pltpu.CompilerParams(
            dimension_semantics=("parallel",)),            # both v7x TCs get work
    )(x, w1b, b1f, w2n, b2n)

    # Drop the zero lane padding outside the kernel.
    return out_full[:, :C]


def init_mlp(key, d_in, d_hidden, d_out):
    k1, k2, k3, k4 = jax.random.split(key, 4)
    w1 = jax.random.normal(k1, (d_in, d_hidden), jnp.float32) * (1.0 / jnp.sqrt(d_in))
    b1 = jax.random.normal(k2, (1, d_hidden), jnp.float32) * 0.01
    w2 = jax.random.normal(k3, (d_hidden, d_out), jnp.float32) * (1.0 / jnp.sqrt(d_hidden))
    b2 = jax.random.normal(k4, (1, d_out), jnp.float32) * 0.01
    return (w1, b1, w2, b2)


def rwrapper_reference(x, params):
    """Reference with the same bf16 matmul operands / f32 accumulation the
    kernel uses, so the comparison is tight."""
    w1, b1, w2, b2 = params
    h = jnp.dot(x.astype(jnp.bfloat16), w1.astype(jnp.bfloat16),
                preferred_element_type=jnp.float32) + b1
    h = jnp.maximum(h, 0.0)
    y = jnp.dot(h.astype(jnp.bfloat16), w2.astype(jnp.bfloat16),
                preferred_element_type=jnp.float32) + b2
    return -y  # RWrapper semantics


if __name__ == "__main__":
    key = jax.random.PRNGKey(0)
    kx, kp = jax.random.split(key)

    # TODO(synk): the wrapped self.model is unspecified in the PyTorch source;
    # a synthetic 2-layer MLP stands in for it.
    B, D, H, C = 16, 32, 64, 16
    x = jax.random.normal(kx, (B, D), jnp.float32)
    params = init_mlp(kp, D, H, C)

    out = rwrapper_forward(x, params)
    out = jax.block_until_ready(out)

    ref = rwrapper_reference(x, params)
    assert out.shape == (B, C)
    assert jnp.allclose(out, ref, atol=1e-4, rtol=1e-4), "mismatch vs reference"

    # loose sanity check against the pure-f32 math as well
    w1, b1, w2, b2 = params
    ref_f32 = -(jnp.maximum(x @ w1 + b1, 0.0) @ w2 + b2)
    assert jnp.allclose(out, ref_f32, atol=5e-2, rtol=5e-2), "bf16 drift too large"

    print("KERNEL_OK")
</pallas_src>

<mosaic_0001>
module attributes {stable_mosaic.version = 11 : i64} {
  func.func @neg_mlp_kernel(%arg0: i32, %arg1: memref<8x32xf32, #tpu.memory_space<vmem>>, %arg2: memref<32x64xbf16, #tpu.memory_space<vmem>>, %arg3: memref<1x64xf32, #tpu.memory_space<vmem>>, %arg4: memref<64x128xbf16, #tpu.memory_space<vmem>>, %arg5: memref<1x128xf32, #tpu.memory_space<vmem>>, %arg6: memref<8x128xf32, #tpu.memory_space<vmem>>) attributes {dimension_semantics = [#tpu.dimension_semantics<parallel>], iteration_bounds = array<i64: 2>, scalar_prefetch = 0 : i64, scratch_operands = 0 : i64, tpu.core_type = #tpu.core_type<tc>, window_params = [{transform_indices = @transform_0, window_bounds = array<i64: 8, 32>}, {pipeline_mode = #tpu.pipeline_mode<synchronous>, transform_indices = @transform_1, window_bounds = array<i64: 32, 64>}, {pipeline_mode = #tpu.pipeline_mode<synchronous>, transform_indices = @transform_2, window_bounds = array<i64: 1, 64>}, {pipeline_mode = #tpu.pipeline_mode<synchronous>, transform_indices = @transform_3, window_bounds = array<i64: 64, 128>}, {pipeline_mode = #tpu.pipeline_mode<synchronous>, transform_indices = @transform_4, window_bounds = array<i64: 1, 128>}, {transform_indices = @transform_5, window_bounds = array<i64: 8, 128>}]} {
    %c0 = arith.constant 0 : index
    %c0_0 = arith.constant 0 : index
    %0 = vector.load %arg1[%c0, %c0_0] : memref<8x32xf32, #tpu.memory_space<vmem>>, vector<8x32xf32>
    %1 = arith.truncf %0 : vector<8x32xf32> to vector<8x32xbf16>
    %c0_1 = arith.constant 0 : index
    %c0_2 = arith.constant 0 : index
    %2 = vector.load %arg2[%c0_1, %c0_2] : memref<32x64xbf16, #tpu.memory_space<vmem>>, vector<32x64xbf16>
    %cst = arith.constant dense<0.000000e+00> : vector<8x64xf32>
    %3 = tpu.matmul %1, %2, %cst {dimension_numbers = #tpu.dot_dimension_numbers<[1], [0], [0], [1], [0, 0, 1, 1], [], []>} : vector<8x32xbf16>, vector<32x64xbf16>, vector<8x64xf32> -> vector<8x64xf32>
    %c0_3 = arith.constant 0 : index
    %c0_4 = arith.constant 0 : index
    %4 = vector.load %arg3[%c0_3, %c0_4] : memref<1x64xf32, #tpu.memory_space<vmem>>, vector<1x64xf32>
    %5 = vector.broadcast %4 : vector<1x64xf32> to vector<8x64xf32>
    %6 = arith.addf %3, %5 : vector<8x64xf32>
    %cst_5 = arith.constant 0.000000e+00 : f32
    %7 = vector.broadcast %cst_5 : f32 to vector<8x64xf32>
    %8 = arith.maximumf %6, %7 : vector<8x64xf32>
    %9 = arith.truncf %8 : vector<8x64xf32> to vector<8x64xbf16>
    %c0_6 = arith.constant 0 : index
    %c0_7 = arith.constant 0 : index
    %10 = vector.load %arg4[%c0_6, %c0_7] : memref<64x128xbf16, #tpu.memory_space<vmem>>, vector<64x128xbf16>
    %cst_8 = arith.constant dense<0.000000e+00> : vector<8x128xf32>
    %11 = tpu.matmul %9, %10, %cst_8 {dimension_numbers = #tpu.dot_dimension_numbers<[1], [0], [0], [1], [0, 0, 1, 1], [], []>} : vector<8x64xbf16>, vector<64x128xbf16>, vector<8x128xf32> -> vector<8x128xf32>
    %c0_9 = arith.constant 0 : index
    %c0_10 = arith.constant 0 : index
    %12 = vector.load %arg5[%c0_9, %c0_10] : memref<1x128xf32, #tpu.memory_space<vmem>>, vector<1x128xf32>
    %13 = vector.broadcast %12 : vector<1x128xf32> to vector<8x128xf32>
    %14 = arith.addf %11, %13 : vector<8x128xf32>
    %c0_11 = arith.constant 0 : index
    %c0_12 = arith.constant 0 : index
    %15 = vector.load %arg6[%c0_11, %c0_12] : memref<8x128xf32, #tpu.memory_space<vmem>>, vector<8x128xf32>
    tpu.vector_store %arg6[%c0_11, %c0_12], %14 {strides = array<i32>} : memref<8x128xf32, #tpu.memory_space<vmem>>, vector<8x128xf32>,
    return
  }
  func.func @transform_0(%arg0: i32) -> (i32, i32) {
    %c0_i32 = arith.constant 0 : i32
    %c0_i32_0 = arith.constant 0 : i32
    return %arg0, %c0_i32 : i32, i32
  }
  func.func @transform_1(%arg0: i32) -> (i32, i32) {
    %c0_i32 = arith.constant 0 : i32
    %c0_i32_0 = arith.constant 0 : i32
    %c0_i32_1 = arith.constant 0 : i32
    return %c0_i32, %c0_i32_0 : i32, i32
  }
  func.func @transform_2(%arg0: i32) -> (i32, i32) {
    %c0_i32 = arith.constant 0 : i32
    %c0_i32_0 = arith.constant 0 : i32
    %c0_i32_1 = arith.constant 0 : i32
    return %c0_i32, %c0_i32_0 : i32, i32
  }
  func.func @transform_3(%arg0: i32) -> (i32, i32) {
    %c0_i32 = arith.constant 0 : i32
    %c0_i32_0 = arith.constant 0 : i32
    %c0_i32_1 = arith.constant 0 : i32
    return %c0_i32, %c0_i32_0 : i32, i32
  }
  func.func @transform_4(%arg0: i32) -> (i32, i32) {
    %c0_i32 = arith.constant 0 : i32
    %c0_i32_0 = arith.constant 0 : i32
    %c0_i32_1 = arith.constant 0 : i32
    return %c0_i32, %c0_i32_0 : i32, i32
  }
  func.func @transform_5(%arg0: i32) -> (i32, i32) {
    %c0_i32 = arith.constant 0 : i32
    %c0_i32_0 = arith.constant 0 : i32
    return %arg0, %c0_i32 : i32, i32
  }
}

</mosaic_0001>

<bundles_post_ra>
// kernel: tpu_custom_call.1
= control target key start
LH: loop header
LB: loop body
LE: loop exit
PB: predicated region body
PF: predicated region fallthrough
CT: control target
= control target key end

     0   :  { %10 = vsyncpa [#allocation3], 0  ;;  %s1094_s0 = inlined_call_operand.hbm [shape: f32[16,32], index: 0, kind: input, shape index: {}]   ;;  %s1095_s1 = inlined_call_operand.hbm [shape: bf16[32,64], index: 1, kind: input, shape index: {}]   ;;  %s1096_s2 = inlined_call_operand.vmem [shape: f32[1,64], index: 2, kind: input, shape index: {}]   ;;  %s1097_s3 = inlined_call_operand.hbm [shape: bf16[64,128], index: 3, kind: input, shape index: {}]   ;;  %s1098_s4 = inlined_call_operand.vmem [shape: f32[1,128], index: 4, kind: input, shape index: {}]   ;;  %s1099_s5 = inlined_call_operand.hbm [shape: f32[16,128], index: 5, kind: output, shape index: {}]  }
   0x1   :  { %12 = vsyncpa [#allocation3 + $0x1], 0 }
   0x2   :  { %13 = vsyncpa [#allocation6], 0 }
   0x3   :  { %14 = vsyncpa [#allocation4], 0 }
   0x4   :  { %16 = vsyncpa [#allocation4 + $0x1], 0  ;;  %s855_s18 = smov 0   ;;  %s857_s19 = smov 0  }
   0x5   :  { %s859_s20 = smov 0   ;;  %s861_s21 = smov 0  }
   0x6 LB: > { %s876_s22 = sadd.s32 4294967295, %s815_s21   ;;  %s528_s23 = sadd.s32 4294967294, %s815_s21   ;;  %s815_s21 = sphi %s861_s21, %s1119_s21   ;;  %s811_s20 = sphi %s859_s20, %s1118_s20   ;;  %s807_s19 = sphi %s857_s19, %s1117_s19   ;;  %s803_s18 = sphi %s855_s18, %s1116_s18  }
   0x7   : > { %p42_p0 = scmp.ne.s32.totalorder %s807_s19, %s803_s18  ;;  %p1100_p1 = scmp.eq.s32.totalorder %s876_s22, 0 }
   0x8   : > { %p156_p3 = scmp.eq.s32.totalorder %s528_s23, 1  ;;  %p529_p5 = scmp.ge.s32.totalorder %s815_s21, 1 }
   0x9   : > { %p885_p4 = por %p1100_p1, %p42_p0  ;;  %p163_p7 = scmp.lt.s32.totalorder %s815_s21, 3 }
   0xa   : > { %p890_p6 = por %p156_p3, %p42_p0  ;;  %s817_s27 = smov [#allocation5]  }
   0xb   : > { %s1103_s24 = scalar_select %p885_p4, 1, 0 }
   0xc   : > { %s1104_s25 = scalar_select %p890_p6, 1, 0 }
   0xd   : > { %p895_p8 = pnand %p529_p5, %p163_p7  ;;  %s175_s28 = sshll.u32 %s817_s27, 4  ;;  %s899_s28 = int_to_ptr.vmem [resolvable:$true] %s175_s28 }
   0xe   : > { %s818_s30 = smov [#allocation7]   ;;  %s659_s9 = scalar_lea.hbm %s1095_s1, 256 }
   0xf   : > { %p594_p9 = pneg %p895_p8  ;;  %s191_s6 = sshll.u32 %s818_s30, 4  ;;  %s910_s6 = int_to_ptr.vmem [resolvable:$true] %s191_s6 }
  0x10   : > { %p660_p12 = scmp.ne.s32.totalorder %s1095_s1, %s659_s9  ;;  %p666_p5 = scmp.lt.u32.totalorder %s659_s9, %s1095_s1 }
  0x11   : > { %p906_p11 = pnand %p594_p9, %p1100_p1 }
  0x13   : > { %p661_p13 = pneg %p906_p11 }
  0x15   : > { %p662_p0 = pnand %p661_p13, %p660_p12 }
  0x17   : > { %p663_p3 = pneg %p662_p0 }
  0x19   : > { %p668_p7 = pnand %p666_p5, %p663_p3 }
  0x1b   : > { %671 = shalt.err (!%p668_p7)
}
  0x1c   : > { %s672_s14 = scalar_lea.vmem %s899_s28, 256  ;;  %p680_p2 = scmp.lt.s32.totalorder %s899_s28, %s899_s28 }
  0x1d   : > { %p673_p9 = scmp.ne.s32.totalorder %s899_s28, %s672_s14  ;;  %p681_p12 = scmp.lt.s32.totalorder %s672_s14, %s672_s14 }
  0x1f   : > { %p675_p10 = pnand %p673_p9, %p661_p13  ;;  %p682_p0 = por %p681_p12, %p680_p2 }
  0x21   : > { %p676_p1 = pneg %p675_p10 }
  0x23   : > { %p683_p6 = pnand %p682_p0, %p676_p1 }
  0x25   : > { %686 = shalt.err (!%p683_p6)
}
  0x26   : > { %s819_s15 = smov 64   ;;  %s820_s16 = smov 4  }
  0x27   : > { %597 = dma.hbm_to_vmem [thread:$0]  (!%p906_p11), %s1095_s1, 256, %s899_s28, [#allocation6], %s819_s15, %s819_s15, %s820_s16  }
  0x28   : > { %s687_s7 = scalar_lea.hbm %s1097_s3, 512 }
  0x29   : > { %p688_p2 = scmp.ne.s32.totalorder %s1097_s3, %s687_s7  ;;  %p694_p10 = scmp.lt.u32.totalorder %s687_s7, %s1097_s3 }
  0x2b   : > { %p690_p1 = pnand %p688_p2, %p661_p13 }
  0x2d   : > { %p691_p6 = pneg %p690_p1 }
  0x2f   : > { %p696_p3 = pnand %p694_p10, %p691_p6 }
  0x31   : > { %699 = shalt.err (!%p696_p3)
}
  0x32   : > { %s700_s28 = scalar_lea.vmem %s910_s6, 512  ;;  %p708_p12 = scmp.lt.s32.totalorder %s910_s6, %s910_s6 }
  0x33   : > { %p701_p5 = scmp.ne.s32.totalorder %s910_s6, %s700_s28  ;;  %p709_p0 = scmp.lt.s32.totalorder %s700_s28, %s700_s28 }
  0x35   : > { %p703_p7 = pnand %p701_p5, %p661_p13  ;;  %p710_p2 = por %p709_p0, %p708_p12 }
  0x37   : > { %p704_p9 = pneg %p703_p7 }
  0x39   : > { %p711_p1 = pnand %p710_p2, %p704_p9 }
  0x3b   : > { %714 = shalt.err (!%p711_p1)
}
  0x3c   : > { %600 = dma.hbm_to_vmem [thread:$0]  (!%p906_p11), %s1097_s3, 512, %s910_s6, [#allocation6], %s819_s15, %s819_s15, %s820_s16  }
  0x3d   : > { %s965_s14 = sadd.s32 1, %s815_s21   ;;  %s29_s29 = sadd.s32 1, %s811_s20 }
  0x3e   : > { %s26_s17 = ssub.s32 %s815_s21, %s965_s14  ;;  %p36_p13 = scmp.ne.s32.totalorder %s811_s20, %s807_s19 }
  0x3f   : > { %p27_p6 = scmp.eq.s32.totalorder %s26_s17, 0  ;;  %p37_p10 = scmp.eq.s32.totalorder %s815_s21, 0 }
  0x40   : > { %p1107_p3 = scmp.eq.s32.totalorder %s876_s22, 1  ;;  %p611_p7 = scmp.lt.s32.totalorder %s815_s21, 2 }
  0x41   : > { %s981_s27 = scalar_select %p27_p6, %s811_s20, %s29_s29  }
  0x42   : > { %p975_p5 = por %p1107_p3, %p36_p13  ;;  %p38_p9 = por %p37_p10, %p36_p13 }
  0x43   : > { %s208_s30 = sand.u32 1, %s811_s20   ;;  %s534_s6 = sshll.u32 %s815_s21, 7 }
  0x44   : > { %s1108_s23 = scalar_select %p975_p5, 1, 0 }
  0x45   : > { %s533_s7 = sshll.u32 %s208_s30, 3  ;;  %s988_s8 = scalar_lea.hbm %s1094_s0, %s534_s6 }
  0x46   : > { %s212_s9 = scalar_lea.vmem [#allocation2], %s533_s7  ;;  %p992_p11 = pnand %p611_p7, %p38_p9 }
  0x47   : > { %s219_s10 = sshll.u32 %s212_s9, 4  ;;  %s209_s28 = scalar_lea.sflag [#allocation3], %s208_s30  ;;  %s990_s10 = int_to_ptr.vmem [resolvable:$true] %s219_s10 }
  0x48   : > { %s715_s12 = scalar_lea.hbm %s988_s8, 128  ;;  %p717_p0 = pneg %p992_p11 }
  0x49   : > { %p716_p12 = scmp.ne.s32.totalorder %s988_s8, %s715_s12  ;;  %s720_s17 = scalar_lea.hbm %s1094_s0, 256 }
  0x4a   : > { %p721_p13 = scmp.lt.u32.totalorder %s988_s8, %s1094_s0  ;;  %p722_p6 = scmp.lt.u32.totalorder %s720_s17, %s715_s12 }
  0x4b   : > { %p718_p2 = pnand %p717_p0, %p716_p12  ;;  %p724_p3 = scmp.lt.u32.totalorder %s715_s12, %s988_s8 }
  0x4c   : > { %p723_p10 = por %p722_p6, %p721_p13 }
  0x4d   : > { %p719_p1 = pneg %p718_p2 }
  0x4e   : > { %p725_p7 = por %p724_p3, %p723_p10 }
  0x50   : > { %p726_p9 = pnand %p725_p7, %p719_p1 }
  0x52   : > { %729 = shalt.err (!%p726_p9)
}
  0x53   : > { %s730_s30 = scalar_lea.vmem %s990_s10, 128  ;;  %s821_s15 = smov [#allocation2]  }
  0x54   : > { %p731_p12 = scmp.ne.s32.totalorder %s990_s10, %s730_s30  ;;  %s735_s16 = sshll.u32 %s821_s15, 4  ;;  %s736_s16 = int_to_ptr.vmem [resolvable:$false] %s735_s16 }
  0x55   : > { %s737_s9 = scalar_lea.vmem %s736_s16, 256  ;;  %p738_p4 = scmp.lt.s32.totalorder %s990_s10, %s736_s16 }
  0x56   : > { %p733_p2 = pnand %p731_p12, %p717_p0  ;;  %p739_p13 = scmp.lt.s32.totalorder %s737_s9, %s730_s30 }
  0x58   : > { %p734_p5 = pneg %p733_p2  ;;  %p740_p6 = por %p739_p13, %p738_p4 }
  0x5a   : > { %p741_p10 = pnand %p740_p6, %p734_p5 }
  0x5c   : > { %744 = shalt.err (!%p741_p10)
}
  0x5d   : > { %604 = dma.hbm_to_vmem [thread:$0]  (!%p992_p11), %s988_s8, 128, %s990_s10, %s209_s28  }
  0x5e   : > { %228 = sbr.rel (%p895_p8) target bundleno = 561 (0x231), region = 40  ;;  %s1024_s12 = sand.u32 (!%p895_p8), 1, %s807_s19  }
  0x5f   : > { %s536_s13 = sshll.u32 (!%p895_p8), %s1024_s12, 3  ;;  %s231_s29 = scalar_lea.sflag (!%p895_p8), [#allocation3], %s1024_s12 }
  0x60   : > { %s234_s17 = scalar_lea.vmem (!%p895_p8), [#allocation2], %s536_s13  ;;  %p1110_p4 = scmp.ne.s32.totalorder (!%p895_p8), %s1103_s24, 0 }
  0x65   : > { %790 = dma.done.wait (%p1110_p4), %s231_s29, 128  }
  0x66   : > { %792 = vsyncadd (%p1110_p4), %s231_s29, 4294967168  ;;  %p1111_p5 = scmp.eq.s32.totalorder %s876_s22, 0 }
  0x68   : > { %794 = dma.done.wait (%p1111_p5), [#allocation6], 768   ;;  %p1112_p8 = pmov %p1111_p5 }
  0x69   : > { %v822_v0 = vmov 0.0   ;;  %vm823_vm0 = vmmov 0   ;;  %v653_v1 = vld [vmem:[#allocation5] sm:$0xff]   ;;  %v654_v2 = vld [vmem:[#allocation5 + $0x8] sm:$0xff]   ;;  %v270_v3 = vld [vmem:[%s234_s17] sm:$0xff]  ;;  %vm295_vm1 = vcmask 261120  }
  0x6a   : > { %796 = vsyncadd (%p1112_p8), [#allocation6], 4294966528  ;;  %562 = vmatprep.subr.bf16.mxu0 %v822_v0  ;;  %566 = vmatprep.mubr.msk.bf16.mxu0 %vm823_vm0, %v822_v0  ;;  %v655_v4 = vld [vmem:[#allocation7] sm:$0xff]   ;;  %v656_v5 = vld [vmem:[#allocation7 + $0x8] sm:$0xff]   ;;  %v271_v6 = vpack.c.bf16 %v270_v3, %v270_v3  ;;  %vm380_vm2 = vcmask 523264   ;;  %s551_s11 = sshll.u32 %s876_s22, 7 }
  0x6b   : > { %570 = vmatprep.subr.bf16.mxu1 %v822_v0  ;;  %578 = vmatprep.mubr.msk.bf16.mxu1 %vm823_vm0, %v822_v0  ;;  %v657_v7 = vld [vmem:[#allocation7 + $0x10] sm:$0xff]   ;;  %v658_v8 = vld [vmem:[#allocation7 + $0x18] sm:$0xff]   ;;  %v540_v9 = vld [vmem:[%s1096_s2] ss:$0 sm:$0xff]  ;;  %s268_s28 = scalar_lea.vmem [#allocation8], %s536_s13  ;;  %s1050_s15 = scalar_lea.hbm %s1099_s5, %s551_s11 }
  0x6c   : > { %563 = vmatpush3.bf16.msra.mxu0 %v653_v1  ;;  %571 = vmatpush3.bf16.msra.mxu1 %v655_v4  ;;  %v544_v17 = vld [vmem:[%s1098_s4] ss:$0 sm:$0xff]  ;;  %s439_s7 = sshll.u32 %s268_s28, 4  ;;  %s426_s22 = scalar_lea.sflag [#allocation4], %s1024_s12  ;;  %s1052_s7 = int_to_ptr.vmem [resolvable:$true] %s439_s7 }
  0x6d   : > { %564 = vmatprep.subr.bf16.mxu0 %v822_v0  ;;  %572 = vmatprep.subr.bf16.mxu1 %v822_v0  ;;  %s745_s16 = scalar_lea.vmem %s1052_s7, 128  ;;  %p1113_p0 = scmp.ne.s32.totalorder %s1108_s23, 0 }
  0x6e   : > { %p746_p11 = scmp.ne.s32.totalorder %s1052_s7, %s745_s16  ;;  %s824_s9 = smov [#allocation8]  }
  0x6f   : > { %s749_s13 = sshll.u32 %s824_s9, 4  ;;  %s750_s13 = int_to_ptr.vmem [resolvable:$false] %s749_s13 }
  0x70   : > { %565 = vmatpush3.bf16.msra.mxu0 %v654_v2  ;;  %573 = vmatpush3.bf16.msra.mxu1 %v656_v5  ;;  %p747_p1 = pnand %p746_p11, %p1113_p0  ;;  %s751_s29 = scalar_lea.vmem %s750_s13, 256 }
  0x71   : > { %574 = vmatprep.subr.bf16.mxu1 %v822_v0  ;;  %p752_p7 = scmp.lt.s32.totalorder %s1052_s7, %s750_s13  ;;  %p753_p9 = scmp.lt.s32.totalorder %s751_s29, %s745_s16 }
  0x72   : > { %p748_p3 = pneg %p747_p1 }
  0x73   : > { %567 = vmatmul.mubr.msk.bf16.vlgmr.msra.gmra.mrb[0].mxu0 %vm295_vm1, %v271_v6  ;;  %p754_p12 = por %p753_p9, %p752_p7 }
  0x74   : > { %575 = vmatpush3.bf16.msra.mxu1 %v657_v7 }
  0x75   : > { %576 = vmatprep.subr.bf16.mxu1 %v822_v0  ;;  %p755_p2 = pnand %p754_p12, %p748_p3 }
  0x78   : > { %577 = vmatpush3.bf16.msra.mxu1 %v658_v8 }
 0x146   : > { %v333_v10 = vpop.f32.mrb[0].mxu0 }
 0x147   : > { %v334_v11 = vadd.f32 %v540_v9, %v333_v10  ;;  %v568_v12 = vpop.f32.mrb[1].mxu0 }
 0x148   : > { %v336_v13 = vpop.f32.mrb[2].mxu0 }
 0x149   : > { %v339_v14 = vmax.f32 %v334_v11, 0.0  ;;  %v569_v15 = vpop.f32.mrb[3].mxu0 }
 0x14b   : > { %v340_v16 = vpack.c.bf16 %v339_v14, %v339_v14 }
 0x14d   : > { %579 = vmatmul.mubr.msk.bf16.vlgmr.msra.gmra.mrb[0].mxu1 %vm380_vm2, %v340_v16 }
 0x220   : > { %v418_v18 = vpop.f32.mrb[0].mxu1 }
 0x221   : > { %v419_v19 = vadd.f32 %v544_v17, %v418_v18  ;;  %v580_v20 = vpop.f32.mrb[1].mxu1 }
 0x222   : > { %v421_v21 = vpop.f32.mrb[2].mxu1 }
 0x223   : > { %424 = vst [vmem:[%s268_s28] sm:$0xff] %v419_v19  ;;  %v581_v22 = vpop.f32.mrb[3].mxu1 }
 0x224   : > { %758 = shalt.err (!%p755_p2)
}
 0x225   : > { %s759_s12 = scalar_lea.hbm %s1050_s15, 128  ;;  %s763_s26 = scalar_lea.hbm %s1099_s5, 256 }
 0x226   : > { %p760_p13 = scmp.ne.s32.totalorder %s1050_s15, %s759_s12  ;;  %p764_p4 = scmp.lt.u32.totalorder %s1050_s15, %s1099_s5 }
 0x227   : > { %p765_p5 = scmp.lt.u32.totalorder %s763_s26, %s759_s12  ;;  %p767_p11 = scmp.lt.u32.totalorder %s759_s12, %s1050_s15 }
 0x228   : > { %p761_p6 = pnand %p760_p13, %p1113_p0 }
 0x229   : > { %p766_p8 = por %p765_p5, %p764_p4 }
 0x22a   : > { %p762_p10 = pneg %p761_p6 }
 0x22b   : > { %p768_p1 = por %p767_p11, %p766_p8 }
 0x22d   : > { %p769_p3 = pnand %p768_p1, %p762_p10 }
 0x22f   : > { %772 = shalt.err (!%p769_p3)
}
 0x230   : > { %592 = dma.vmem_to_hbm [thread:$0]  (%p1113_p0), %s1052_s7, 128, %s1050_s15, %s426_s22  }
 0x231 PF: > { %s451_s11 = sand.u32 1, %s803_s18   ;;  %p1114_p7 = scmp.ne.s32.totalorder %s1104_s25, 0 }
 0x232   : > { %p1115_p9 = scmp.ge.s32.totalorder %s815_s21, 2  ;;  %s452_s28 = scalar_lea.sflag [#allocation4], %s451_s11 }
 0x234   : > { %p606_p12 = pnand %p1115_p9, %p1114_p7 }
 0x236   : > { %798 = dma.done.wait (!%p606_p12), %s452_s28, 128  }
 0x237   : > { %800 = vsyncadd (!%p606_p12), %s452_s28, 4294967168  ;;  %p19_p2 = scmp.ge.s32.totalorder %s965_s14, 4   ;;  %s1116_s18 = smov %s807_s19 }
 0x238   : > { %s1117_s19 = smov %s811_s20  ;;  %s1118_s20 = smov %s981_s27 }
 0x239   : > { %s1119_s21 = smov %s965_s14  ;;  %21 = sbr.rel (!%p19_p2) target bundleno = 6 (0x6), region = 93 }
 0x240   :  { %457 = vsyncpa [#allocation3], 1 }
 0x241   :  { %459 = vsyncpa [#allocation3 + $0x1], 1 }
 0x242   :  { %460 = vsyncpa [#allocation6], 1 }
 0x243   :  { %461 = vsyncpa [#allocation4], 1 }
 0x244   :  { %463 = vsyncpa [#allocation4 + $0x1], 1 }

</bundles_post_ra>
